<compile_context>
chip_gen: v6e
topology: v6e:2x2x1
jax: 0.10.0
libtpu: 0.0.40
codegen_flags: <defaults>
</compile_context>

<pallas_src>
import jax
import jax.numpy as jnp
from jax.experimental import pallas as pl
from jax.experimental.pallas import tpu as pltpu


def _round_up(x, m):
    return (x + m - 1) // m * m


def mlp_kernel(x_ref,
               w1_ref, b1_ref,
               w2_ref, b2_ref,
               w3_ref, b3_ref,
               w4_ref, b4_ref,
               o_ref):
    """Whole MLP forward for one batch tile (batch on the lane axis)."""
    x = x_ref[...]

    # fc1 + relu   (dropout = identity in eval mode)
    h = jnp.dot(w1_ref[...], x, preferred_element_type=jnp.float32) + b1_ref[...]
    h = jnp.maximum(h, 0.0)

    # fc2 + relu   (dropout = identity in eval mode)
    h = jnp.dot(w2_ref[...], h.astype(w2_ref.dtype),
                preferred_element_type=jnp.float32) + b2_ref[...]
    h = jnp.maximum(h, 0.0)

    # fc3 + relu
    h = jnp.dot(w3_ref[...], h.astype(w3_ref.dtype),
                preferred_element_type=jnp.float32) + b3_ref[...]
    h = jnp.maximum(h, 0.0)

    # fc4 (no activation)
    h = jnp.dot(w4_ref[...], h.astype(w4_ref.dtype),
                preferred_element_type=jnp.float32) + b4_ref[...]

    o_ref[...] = h.astype(o_ref.dtype)


def currency_prediction_nn(x, params, *, tile_b=2048, compute_dtype=jnp.float32):
    """x: [B, input_dim]. params: PyTorch-layout weights w{i}:[out,in], b{i}:[out,1].

    Returns [B, output_dim] float32. Set compute_dtype=jnp.bfloat16 for the
    HBM-bandwidth-bound case (f32 accumulation is kept via
    preferred_element_type); the default f32 matches the reference tightly.
    """
    B, in_dim = x.shape
    out_dim = params["w4"].shape[0]

    # Batch tile: multiple of 128 lanes, capped so 2 double-buffered input/output
    # tiles + ~8 KB of resident weights stay tiny vs every generation's VMEM
    # (v7x has only 64 MiB).
    tb = min(int(tile_b), _round_up(B, 128))
    tb = _round_up(tb, 128)
    Bp = _round_up(B, tb)

    # Transpose to [features, batch] and zero-pad the batch to a tile multiple.
    xt = jnp.pad(x.T.astype(compute_dtype), ((0, 0), (0, Bp - B)))

    wb = []
    for i in range(1, 5):
        wb.append(params[f"w{i}"].astype(compute_dtype))
        wb.append(params[f"b{i}"].astype(jnp.float32))   # biases stay f32

    # Weights/biases: constant index map -> stay VMEM-resident across tiles.
    def resident(arr):
        return pl.BlockSpec(arr.shape, lambda i: (0,) * arr.ndim)

    grid = (Bp // tb,)

    out_t = pl.pallas_call(
        mlp_kernel,
        out_shape=jax.ShapeDtypeStruct((out_dim, Bp), jnp.float32),
        grid=grid,
        in_specs=[pl.BlockSpec((in_dim, tb), lambda i: (0, i))]
                 + [resident(a) for a in wb],
        out_specs=pl.BlockSpec((out_dim, tb), lambda i: (0, i)),
        compiler_params=pltpu.CompilerParams(
            dimension_semantics=("parallel",)),   # megacore sharding on v7x
    )(xt, *wb)

    # Back to [batch, output_dim], dropping batch padding.
    return out_t[:, :B].T


def init_params(key, input_dim, hidden_dim, output_dim):
    """Deterministic init matching nn.Linear (weight [out,in], bias kept [out,1])."""
    dims = [(input_dim, hidden_dim),
            (hidden_dim, hidden_dim),
            (hidden_dim, hidden_dim // 2),
            (hidden_dim // 2, output_dim)]
    params = {}
    for i, (fan_in, fan_out) in enumerate(dims, start=1):
        key, kw, kb = jax.random.split(key, 3)
        bound = 1.0 / (fan_in ** 0.5)   # PyTorch default uniform(-1/sqrt(fan_in), ...)
        params[f"w{i}"] = jax.random.uniform(
            kw, (fan_out, fan_in), jnp.float32, -bound, bound)
        params[f"b{i}"] = jax.random.uniform(
            kb, (fan_out, 1), jnp.float32, -bound, bound)
    return params


def reference_forward(x, params):
    h = jnp.maximum(x @ params["w1"].T + params["b1"].T, 0.0)
    h = jnp.maximum(h @ params["w2"].T + params["b2"].T, 0.0)
    h = jnp.maximum(h @ params["w3"].T + params["b3"].T, 0.0)
    return h @ params["w4"].T + params["b4"].T


if __name__ == "__main__":
    input_dim, hidden_dim, output_dim = 16, 32, 4
    batch = 8

    key = jax.random.PRNGKey(0)
    key, kx = jax.random.split(key)
    x = jax.random.normal(kx, (batch, input_dim), jnp.float32)
    params = init_params(key, input_dim, hidden_dim, output_dim)

    out = currency_prediction_nn(x, params)
    out = jax.block_until_ready(out)

    ref = reference_forward(x, params)
    assert out.shape == (batch, output_dim)
    assert jnp.allclose(out, ref, atol=1e-4, rtol=1e-4), "mismatch vs JAX reference"

    print("KERNEL_OK")
</pallas_src>

<mosaic_0001>
module attributes {stable_mosaic.version = 11 : i64} {
  func.func @mlp_kernel(%arg0: i32, %arg1: memref<16x128xf32, #tpu.memory_space<vmem>>, %arg2: memref<32x16xf32, #tpu.memory_space<vmem>>, %arg3: memref<32x1xf32, #tpu.memory_space<vmem>>, %arg4: memref<32x32xf32, #tpu.memory_space<vmem>>, %arg5: memref<32x1xf32, #tpu.memory_space<vmem>>, %arg6: memref<16x32xf32, #tpu.memory_space<vmem>>, %arg7: memref<16x1xf32, #tpu.memory_space<vmem>>, %arg8: memref<4x16xf32, #tpu.memory_space<vmem>>, %arg9: memref<4x1xf32, #tpu.memory_space<vmem>>, %arg10: memref<4x128xf32, #tpu.memory_space<vmem>>) attributes {dimension_semantics = [#tpu.dimension_semantics<parallel>], iteration_bounds = array<i64: 1>, scalar_prefetch = 0 : i64, scratch_operands = 0 : i64, tpu.core_type = #tpu.core_type<tc>, window_params = [{transform_indices = @transform_0, window_bounds = array<i64: 16, 128>}, {pipeline_mode = #tpu.pipeline_mode<synchronous>, transform_indices = @transform_1, window_bounds = array<i64: 32, 16>}, {pipeline_mode = #tpu.pipeline_mode<synchronous>, transform_indices = @transform_2, window_bounds = array<i64: 32, 1>}, {pipeline_mode = #tpu.pipeline_mode<synchronous>, transform_indices = @transform_3, window_bounds = array<i64: 32, 32>}, {pipeline_mode = #tpu.pipeline_mode<synchronous>, transform_indices = @transform_4, window_bounds = array<i64: 32, 1>}, {pipeline_mode = #tpu.pipeline_mode<synchronous>, transform_indices = @transform_5, window_bounds = array<i64: 16, 32>}, {pipeline_mode = #tpu.pipeline_mode<synchronous>, transform_indices = @transform_6, window_bounds = array<i64: 16, 1>}, {pipeline_mode = #tpu.pipeline_mode<synchronous>, transform_indices = @transform_7, window_bounds = array<i64: 4, 16>}, {pipeline_mode = #tpu.pipeline_mode<synchronous>, transform_indices = @transform_8, window_bounds = array<i64: 4, 1>}, {transform_indices = @transform_9, window_bounds = array<i64: 4, 128>}]} {
    %c0 = arith.constant 0 : index
    %c0_0 = arith.constant 0 : index
    %0 = vector.load %arg1[%c0, %c0_0] : memref<16x128xf32, #tpu.memory_space<vmem>>, vector<16x128xf32>
    %c0_1 = arith.constant 0 : index
    %c0_2 = arith.constant 0 : index
    %1 = vector.load %arg2[%c0_1, %c0_2] : memref<32x16xf32, #tpu.memory_space<vmem>>, vector<32x16xf32>
    %cst = arith.constant dense<0.000000e+00> : vector<32x128xf32>
    %2 = tpu.matmul %1, %0, %cst {dimension_numbers = #tpu.dot_dimension_numbers<[1], [0], [0], [1], [0, 0, 1, 1], [], []>} : vector<32x16xf32>, vector<16x128xf32>, vector<32x128xf32> -> vector<32x128xf32>
    %c0_3 = arith.constant 0 : index
    %c0_4 = arith.constant 0 : index
    %3 = vector.load %arg3[%c0_3, %c0_4] : memref<32x1xf32, #tpu.memory_space<vmem>>, vector<32x1xf32>
    %4 = vector.broadcast %3 : vector<32x1xf32> to vector<32x128xf32>
    %5 = arith.addf %2, %4 : vector<32x128xf32>
    %cst_5 = arith.constant 0.000000e+00 : f32
    %6 = vector.broadcast %cst_5 : f32 to vector<32x128xf32>
    %7 = arith.maximumf %5, %6 : vector<32x128xf32>
    %c0_6 = arith.constant 0 : index
    %c0_7 = arith.constant 0 : index
    %8 = vector.load %arg4[%c0_6, %c0_7] : memref<32x32xf32, #tpu.memory_space<vmem>>, vector<32x32xf32>
    %cst_8 = arith.constant dense<0.000000e+00> : vector<32x128xf32>
    %9 = tpu.matmul %8, %7, %cst_8 {dimension_numbers = #tpu.dot_dimension_numbers<[1], [0], [0], [1], [0, 0, 1, 1], [], []>} : vector<32x32xf32>, vector<32x128xf32>, vector<32x128xf32> -> vector<32x128xf32>
    %c0_9 = arith.constant 0 : index
    %c0_10 = arith.constant 0 : index
    %10 = vector.load %arg5[%c0_9, %c0_10] : memref<32x1xf32, #tpu.memory_space<vmem>>, vector<32x1xf32>
    %11 = vector.broadcast %10 : vector<32x1xf32> to vector<32x128xf32>
    %12 = arith.addf %9, %11 : vector<32x128xf32>
    %cst_11 = arith.constant 0.000000e+00 : f32
    %13 = vector.broadcast %cst_11 : f32 to vector<32x128xf32>
    %14 = arith.maximumf %12, %13 : vector<32x128xf32>
    %c0_12 = arith.constant 0 : index
    %c0_13 = arith.constant 0 : index
    %15 = vector.load %arg6[%c0_12, %c0_13] : memref<16x32xf32, #tpu.memory_space<vmem>>, vector<16x32xf32>
    %cst_14 = arith.constant dense<0.000000e+00> : vector<16x128xf32>
    %16 = tpu.matmul %15, %14, %cst_14 {dimension_numbers = #tpu.dot_dimension_numbers<[1], [0], [0], [1], [0, 0, 1, 1], [], []>} : vector<16x32xf32>, vector<32x128xf32>, vector<16x128xf32> -> vector<16x128xf32>
    %c0_15 = arith.constant 0 : index
    %c0_16 = arith.constant 0 : index
    %17 = vector.load %arg7[%c0_15, %c0_16] : memref<16x1xf32, #tpu.memory_space<vmem>>, vector<16x1xf32>
    %18 = vector.broadcast %17 : vector<16x1xf32> to vector<16x128xf32>
    %19 = arith.addf %16, %18 : vector<16x128xf32>
    %cst_17 = arith.constant 0.000000e+00 : f32
    %20 = vector.broadcast %cst_17 : f32 to vector<16x128xf32>
    %21 = arith.maximumf %19, %20 : vector<16x128xf32>
    %c0_18 = arith.constant 0 : index
    %c0_19 = arith.constant 0 : index
    %22 = vector.load %arg8[%c0_18, %c0_19] : memref<4x16xf32, #tpu.memory_space<vmem>>, vector<4x16xf32>
    %cst_20 = arith.constant dense<0.000000e+00> : vector<4x128xf32>
    %23 = tpu.matmul %22, %21, %cst_20 {dimension_numbers = #tpu.dot_dimension_numbers<[1], [0], [0], [1], [0, 0, 1, 1], [], []>} : vector<4x16xf32>, vector<16x128xf32>, vector<4x128xf32> -> vector<4x128xf32>
    %c0_21 = arith.constant 0 : index
    %c0_22 = arith.constant 0 : index
    %24 = vector.load %arg9[%c0_21, %c0_22] : memref<4x1xf32, #tpu.memory_space<vmem>>, vector<4x1xf32>
    %25 = vector.broadcast %24 : vector<4x1xf32> to vector<4x128xf32>
    %26 = arith.addf %23, %25 : vector<4x128xf32>
    %c0_23 = arith.constant 0 : index
    %c0_24 = arith.constant 0 : index
    %27 = vector.load %arg10[%c0_23, %c0_24] : memref<4x128xf32, #tpu.memory_space<vmem>>, vector<4x128xf32>
    tpu.vector_store %arg10[%c0_23, %c0_24], %26 {strides = array<i32>} : memref<4x128xf32, #tpu.memory_space<vmem>>, vector<4x128xf32>,
    return
  }
  func.func @transform_0(%arg0: i32) -> (i32, i32) {
    %c0_i32 = arith.constant 0 : i32
    %c0_i32_0 = arith.constant 0 : i32
    return %c0_i32, %arg0 : i32, i32
  }
  func.func @transform_1(%arg0: i32) -> (i32, i32) {
    %c0_i32 = arith.constant 0 : i32
    %c0_i32_0 = arith.constant 0 : i32
    %c0_i32_1 = arith.constant 0 : i32
    return %c0_i32, %c0_i32_0 : i32, i32
  }
  func.func @transform_2(%arg0: i32) -> (i32, i32) {
    %c0_i32 = arith.constant 0 : i32
    %c0_i32_0 = arith.constant 0 : i32
    %c0_i32_1 = arith.constant 0 : i32
    return %c0_i32, %c0_i32_0 : i32, i32
  }
  func.func @transform_3(%arg0: i32) -> (i32, i32) {
    %c0_i32 = arith.constant 0 : i32
    %c0_i32_0 = arith.constant 0 : i32
    %c0_i32_1 = arith.constant 0 : i32
    return %c0_i32, %c0_i32_0 : i32, i32
  }
  func.func @transform_4(%arg0: i32) -> (i32, i32) {
    %c0_i32 = arith.constant 0 : i32
    %c0_i32_0 = arith.constant 0 : i32
    %c0_i32_1 = arith.constant 0 : i32
    return %c0_i32, %c0_i32_0 : i32, i32
  }
  func.func @transform_5(%arg0: i32) -> (i32, i32) {
    %c0_i32 = arith.constant 0 : i32
    %c0_i32_0 = arith.constant 0 : i32
    %c0_i32_1 = arith.constant 0 : i32
    return %c0_i32, %c0_i32_0 : i32, i32
  }
  func.func @transform_6(%arg0: i32) -> (i32, i32) {
    %c0_i32 = arith.constant 0 : i32
    %c0_i32_0 = arith.constant 0 : i32
    %c0_i32_1 = arith.constant 0 : i32
    return %c0_i32, %c0_i32_0 : i32, i32
  }
  func.func @transform_7(%arg0: i32) -> (i32, i32) {
    %c0_i32 = arith.constant 0 : i32
    %c0_i32_0 = arith.constant 0 : i32
    %c0_i32_1 = arith.constant 0 : i32
    return %c0_i32, %c0_i32_0 : i32, i32
  }
  func.func @transform_8(%arg0: i32) -> (i32, i32) {
    %c0_i32 = arith.constant 0 : i32
    %c0_i32_0 = arith.constant 0 : i32
    %c0_i32_1 = arith.constant 0 : i32
    return %c0_i32, %c0_i32_0 : i32, i32
  }
  func.func @transform_9(%arg0: i32) -> (i32, i32) {
    %c0_i32 = arith.constant 0 : i32
    %c0_i32_0 = arith.constant 0 : i32
    return %c0_i32, %arg0 : i32, i32
  }
}

</mosaic_0001>

<bundles_post_ra>
// kernel: tpu_custom_call.1
= control target key start
LH: loop header
LB: loop body
LE: loop exit
PB: predicated region body
PF: predicated region fallthrough
CT: control target
= control target key end

     0   :  { %vm63_vm0 = vcmask 130048   ;;  %v591_v4 = vmov 0   ;;  %s731_s0 = inlined_call_operand.vmem [shape: f32[16,128], index: 0, kind: input, shape index: {}]   ;;  %s732_s1 = inlined_call_operand.vmem [shape: f32[32,16], index: 1, kind: input, shape index: {}]   ;;  %s733_s2 = inlined_call_operand.vmem [shape: f32[32,1], index: 2, kind: input, shape index: {}]   ;;  %s734_s3 = inlined_call_operand.vmem [shape: f32[32,32], index: 3, kind: input, shape index: {}]   ;;  %s735_s4 = inlined_call_operand.vmem [shape: f32[32,1], index: 4, kind: input, shape index: {}]   ;;  %s736_s5 = inlined_call_operand.vmem [shape: f32[16,32], index: 5, kind: input, shape index: {}]   ;;  %s737_s6 = inlined_call_operand.vmem [shape: f32[16,1], index: 6, kind: input, shape index: {}]   ;;  %s738_s7 = inlined_call_operand.vmem [shape: f32[4,16], index: 7, kind: input, shape index: {}]   ;;  %s739_s8 = inlined_call_operand.vmem [shape: f32[4,1], index: 8, kind: input, shape index: {}]   ;;  %s740_s9 = inlined_call_operand.hbm [shape: f32[4,128], index: 9, kind: output, shape index: {}]  }
   0x1   :  { %v34_v0 = vld [vmem:[%s731_s0 + $0x8] sm:$0xff]  ;;  %v33_v1 = vld [vmem:[%s731_s0] sm:$0xff]  ;;  %567 = vset.pattern.permute.xlu0 %v591_v4  ;;  %v42_v5 = vld [vmem:[%s733_s2 + $0x18] sm:$0xff]  ;;  %568 = vset.pattern.permute.xlu1 %v591_v4 }
   0x2   :  { %v35_v2 = vld [vmem:[%s732_s1] sm:$0xff]  ;;  %521 = vmatprep.subr.mxu0 %v34_v0  ;;  %v36_v3 = vld [vmem:[%s732_s1 + $0x8] sm:$0xff]  ;;  %v37_v6 = vld [vmem:[%s732_s1 + $0x10] sm:$0xff]  ;;  %60 = vperm.xlu0 %567, %v42_v5  }
   0x3   :  { %525 = vmatprep.mubr.msk.f32.mxu0 %vm63_vm0, %v35_v2  ;;  %522 = vmatpush3.msra.mxu0 %v34_v0  ;;  %v40_v7 = vld [vmem:[%s733_s2 + $0x8] sm:$0xff]  ;;  %v41_v8 = vld [vmem:[%s733_s2 + $0x10] sm:$0xff] }
   0x4   :  { %523 = vmatprep.subr.mxu0 %v33_v1  ;;  %50 = vperm.xlu1 %568, %v40_v7  }
   0x5   :  { %524 = vmatpush3.msra.mxu0 %v33_v1 }
   0x6   :  { %526 = vmatmul.mubr.msk.f32.vlgmr.msra.gmra.mxu0 %vm63_vm0, %v36_v3 }
   0x7   :  { %14 = vsyncpa [#allocation3], 0  ;;  %528 = vmatprep.mubr.msk.f32.mxu0 %vm63_vm0, %v37_v6  ;;  %v38_v9 = vld [vmem:[%s732_s1 + $0x18] sm:$0xff]  ;;  %v39_v10 = vld [vmem:[%s733_s2] sm:$0xff]  ;;  %55 = vperm.xlu0 %567, %v41_v8   ;;  %vm193_vm1 = vcmask 261120   ;;  %v592_v56 = vmov 0.0  }
   0x8   :  { %v172_v11 = vld [vmem:[%s735_s4 + $0x18] sm:$0xff]  ;;  %45 = vperm.xlu1 %568, %v39_v10   ;;  %v171_v12 = vld [vmem:[%s735_s4 + $0x10] sm:$0xff]  ;;  %v170_v13 = vld [vmem:[%s735_s4 + $0x8] sm:$0xff]  ;;  %vm593_vm2 = vmmov 0  }
   0x9   :  { %v169_v14 = vld [vmem:[%s735_s4] sm:$0xff]  ;;  %v298_v15 = vld [vmem:[%s737_s6 + $0x8] sm:$0xff]  ;;  %v167_v36 = vld [vmem:[%s734_s3 + $0x10] sm:$0xff] }
   0xa   :  { %529 = vmatmul.mubr.msk.f32.gmra.mxu0 %vm63_vm0, %v38_v9  ;;  %v297_v16 = vld [vmem:[%s737_s6] sm:$0xff]  ;;  %v166_v35 = vld [vmem:[%s734_s3 + $0x8] sm:$0xff]  ;;  %v168_v37 = vld [vmem:[%s734_s3 + $0x18] sm:$0xff] }
   0xb   :  { %190 = vperm.xlu0 %567, %v172_v11   ;;  %v393_v17 = vld [vmem:[%s739_s8] sm:$0xf]  ;;  %v296_v55 = vld [vmem:[%s736_s5 + $0x8] sm:$0xff] }
   0xc   :  { %185 = vperm.xlu1 %568, %v171_v12   ;;  %v165_v18 = vld [vmem:[%s734_s3] sm:$0xff] }
   0xd   :  { %539 = vmatprep.mubr.msk.f32.mxu1 %vm193_vm1, %v165_v18  ;;  %v295_v38 = vld [vmem:[%s736_s5] sm:$0xff]  ;;  %s594_s5 = smov [#allocation2]  }
   0xe   :  { %553 = vmatprep.mubr.msk.f32.mxu0 %vm193_vm1, %v295_v38  ;;  %v392_v1 = vld [vmem:[%s738_s7] sm:$0xf]  ;;  %s479_s28 = sshll.u32 %s594_s5, 4  ;;  %s480_s28 = int_to_ptr.vmem [resolvable:$true] %s479_s28 }
   0xf   :  { %180 = vperm.xlu0 %567, %v170_v13   ;;  %s569_s29 = scalar_lea.vmem %s480_s28, 64  ;;  %p574_p1 = scmp.lt.s32.totalorder %s480_s28, %s480_s28 }
  0x10   :  { %175 = vperm.xlu1 %568, %v169_v14   ;;  %p570_p0 = scmp.ne.s32.totalorder %s480_s28, %s569_s29  ;;  %p575_p2 = scmp.lt.s32.totalorder %s569_s29, %s569_s29 }
  0x12   :  { %p576_p3 = por %p575_p2, %p574_p1 }
  0x13   :  { %306 = vperm.xlu0 %567, %v298_v15  }
  0x14   :  { %301 = vperm.xlu1 %568, %v297_v16   ;;  %p577_p4 = pnand %p576_p3, %p570_p0 }
  0x17   :  { %396 = vperm.xlu0 %567, %v393_v17  }
  0x7d   :  { %v61_v19 = vpop.permute.xlu0 %60 }
  0x7f   :  { %v51_v21 = vpop.permute.xlu1 %50 }
  0x82   :  { %v56_v25 = vpop.permute.xlu0 %55 }
  0x83   :  { %v46_v30 = vpop.permute.xlu1 %45 }
  0x86   :  { %v191_v39 = vpop.permute.xlu0 %190 }
  0x87   :  { %v186_v41 = vpop.permute.xlu1 %185 }
  0x8a   :  { %v181_v45 = vpop.permute.xlu0 %180 }
  0x8b   :  { %v176_v50 = vpop.permute.xlu1 %175 }
  0x8e   :  { %v307_v57 = vpop.permute.xlu0 %306 }
  0x8f   :  { %v302_v60 = vpop.permute.xlu1 %301 }
  0x92   :  { %v397_v2 = vpop.permute.xlu0 %396 }
  0xc6   :  { %v527_v20 = vpop.f32.mrf.mxu0 }
  0xc7   :  { %v148_v27 = vadd.f32 %v527_v20, %v51_v21 }
  0xc8   :  { %v142_v22 = vpop.f32.mrf.mxu0 }
  0xc9   :  { %v143_v31 = vadd.f32 %v142_v22, %v46_v30  ;;  %v162_v33 = vmax.f32 %v148_v27, 0.0 }
  0xca   :  { %v530_v23 = vpop.f32.mrf.mxu0 }
  0xcb   :  { %v158_v24 = vadd.f32 %v530_v23, %v61_v19  ;;  %v161_v34 = vmax.f32 %v143_v31, 0.0 }
  0xcc   :  { %v152_v26 = vpop.f32.mrf.mxu0 }
  0xcd   :  { %v164_v28 = vmax.f32 %v158_v24, 0.0  ;;  %v153_v29 = vadd.f32 %v152_v26, %v56_v25 }
  0xcf   :  { %v163_v32 = vmax.f32 %v153_v29, 0.0  ;;  %531 = vmatprep.subr.mxu1 %v164_v28 }
  0xd0   :  { %532 = vmatpush3.msra.mxu1 %v164_v28 }
  0xd1   :  { %533 = vmatprep.subr.mxu1 %v163_v32 }
  0xd2   :  { %534 = vmatpush3.msra.mxu1 %v163_v32 }
  0xd3   :  { %535 = vmatprep.subr.mxu1 %v162_v33 }
  0xd4   :  { %536 = vmatpush3.msra.mxu1 %v162_v33 }
  0xd5   :  { %537 = vmatprep.subr.mxu1 %v161_v34 }
  0xd6   :  { %538 = vmatpush3.msra.mxu1 %v161_v34 }
  0xd7   :  { %540 = vmatmul.mubr.msk.f32.vlgmr.msra.gmra.mxu1 %vm193_vm1, %v166_v35 }
  0xd8   :  { %542 = vmatprep.mubr.msk.f32.mxu1 %vm193_vm1, %v167_v36 }
  0xdb   :  { %543 = vmatmul.mubr.msk.f32.gmra.mxu1 %vm193_vm1, %v168_v37 }
 0x197   :  { %v541_v40 = vpop.f32.mrf.mxu1 }
 0x198   :  { %v278_v47 = vadd.f32 %v541_v40, %v181_v45 }
 0x199   :  { %v272_v42 = vpop.f32.mrf.mxu1 }
 0x19a   :  { %v273_v51 = vadd.f32 %v272_v42, %v176_v50  ;;  %v292_v53 = vmax.f32 %v278_v47, 0.0 }
 0x19b   :  { %v544_v43 = vpop.f32.mrf.mxu1 }
 0x19c   :  { %v288_v44 = vadd.f32 %v544_v43, %v191_v39  ;;  %v291_v54 = vmax.f32 %v273_v51, 0.0 }
 0x19d   :  { %v282_v46 = vpop.f32.mrf.mxu1 }
 0x19e   :  { %v294_v48 = vmax.f32 %v288_v44, 0.0  ;;  %v283_v49 = vadd.f32 %v282_v46, %v186_v41 }
 0x1a0   :  { %v293_v52 = vmax.f32 %v283_v49, 0.0  ;;  %545 = vmatprep.subr.mxu0 %v294_v48 }
 0x1a1   :  { %546 = vmatpush3.msra.mxu0 %v294_v48 }
 0x1a2   :  { %547 = vmatprep.subr.mxu0 %v293_v52 }
 0x1a3   :  { %548 = vmatpush3.msra.mxu0 %v293_v52 }
 0x1a4   :  { %549 = vmatprep.subr.mxu0 %v292_v53 }
 0x1a5   :  { %550 = vmatpush3.msra.mxu0 %v292_v53 }
 0x1a6   :  { %551 = vmatprep.subr.mxu0 %v291_v54 }
 0x1a7   :  { %552 = vmatpush3.msra.mxu0 %v291_v54 }
 0x1a8   :  { %554 = vmatmul.mubr.msk.f32.vlgmr.msra.gmra.mxu0 %vm193_vm1, %v296_v55  ;;  %556 = vmatprep.subr.mxu0 %v592_v56 }
 0x1a9   :  { %560 = vmatprep.mubr.msk.f32.mxu0 %vm593_vm2, %v592_v56 }
 0x268   :  { %v555_v58 = vpop.f32.mrf.mxu0 }
 0x269   :  { %v387_v59 = vadd.f32 %v555_v58, %v307_v57 }
 0x26a   :  { %v381_v61 = vpop.f32.mrf.mxu0 }
 0x26b   :  { %v391_v62 = vmax.f32 %v387_v59, 0.0  ;;  %v382_v63 = vadd.f32 %v381_v61, %v302_v60 }
 0x26d   :  { %v390_v0 = vmax.f32 %v382_v63, 0.0  ;;  %557 = vmatpush3.msra.mxu0 %v391_v62 }
 0x26e   :  { %558 = vmatprep.subr.mxu0 %v592_v56 }
 0x26f   :  { %559 = vmatpush3.msra.mxu0 %v390_v0 }
 0x270   :  { %561 = vmatmul.mubr.msk.f32.vlgmr.msra.gmra.mxu0 %vm63_vm0, %v392_v1 }
 0x330   :  { %v468_v3 = vpop.f32.mrf.mxu0 }
 0x331   :  { %v469_v4 = vadd.f32 %v468_v3, %v397_v2 }
 0x332   :  { %v562_v5 = vpop.f32.mrf.mxu0 }
 0x333   :  { %472 = vst [vmem:[#allocation2] sm:$0xf] %v469_v4 }
 0x334   :  { %580 = shalt.err (!%p577_p4)
}
 0x335   :  { %482 = dma.vmem_to_hbm [thread:$0]  %s480_s28, 64, %s740_s9, [#allocation3]  }
 0x336   :  { %589 = dma.done.wait [#allocation3], 64  }
 0x337   :  { %590 = vsyncadd [#allocation3], 4294967232 }
 0x338   :  { %486 = vsyncpa [#allocation3], 1 }

</bundles_post_ra>
